<compile_context>
chip_gen: v7x
topology: tpu7x:2x2x1
jax: 0.10.0
libtpu: 0.0.40
codegen_flags: <defaults>
</compile_context>

<pallas_src>
import functools

import jax
import jax.numpy as jnp
from jax.experimental import pallas as pl
from jax.experimental.pallas import tpu as pltpu


def _round_up(v, m):
    return ((v + m - 1) // m) * m


def _pick_tile(dim, cap):
    """Pick a lane-friendly tile: a multiple of 128 that is <= cap and divides
    round_up(dim, 128), so padding along this axis never exceeds 127."""
    d128 = _round_up(dim, 128)
    if d128 <= cap:
        return d128
    best = 128
    t = 256
    while t <= cap:
        if d128 % t == 0:
            best = t
        t += 128
    return best


def _fc_kernel(x_ref, w_ref, b_ref, o_ref, *, apply_relu):
    k = pl.program_id(2)

    @pl.when(k == 0)
    def _():
        o_ref[...] = jnp.zeros_like(o_ref)

    x = x_ref[...]
    if x.dtype != w_ref.dtype:
        # bf16 weight stream: run the MXU in bf16, accumulate in f32.
        x = x.astype(w_ref.dtype)
    o_ref[...] += jnp.dot(x, w_ref[...], preferred_element_type=jnp.float32)

    @pl.when(k == pl.num_programs(2) - 1)
    def _():
        y = o_ref[...] + b_ref[...]          # (1, tn) f32 bias broadcasts over rows
        if apply_relu:
            y = jnp.maximum(y, 0.0)
        o_ref[...] = y.astype(o_ref.dtype)


def init_fc_params(weight, bias, *, param_dtype=jnp.float32,
                   tn_cap=512, tk_cap=1024):
    """One-time parameter prep (do NOT call per forward).

    weight: (N, K) float32 in PyTorch nn.Linear layout.
    bias:   (N,)   float32.
    Pads to tile multiples, transposes the weight to (Kp, Np) so the kernel
    runs a canonical row-major matmul, and optionally casts the weight to bf16.
    """
    N, K = weight.shape
    tn = _pick_tile(N, tn_cap)
    tk = _pick_tile(K, tk_cap)
    Np, Kp = _round_up(N, tn), _round_up(K, tk)

    wp = weight
    if Np != N or Kp != K:
        wp = jnp.pad(weight, ((0, Np - N), (0, Kp - K)))
    weight_t = jnp.asarray(wp.T, dtype=param_dtype)      # (Kp, Np), materialized once
    bp = bias if Np == N else jnp.pad(bias, (0, Np - N))
    bias2d = bp.reshape(1, Np).astype(jnp.float32)
    return dict(weight_t=weight_t, bias2d=bias2d, n=N, k=K, tn=tn, tk=tk)


@functools.partial(jax.jit, static_argnames=("relu", "n", "k", "tn", "tk"))
def _fc_forward_impl(x2, weight_t, bias2d, *, relu, n, k, tn, tk):
    M = x2.shape[0]
    Kp, Np = weight_t.shape

    # tm: multiple of the sublane minimum (8 for f32, 16 for bf16 activations),
    # capped at 512.  Shrink so there are >= 2 parallel (i, j) blocks when M
    # allows it (keeps both v7x TensorCores busy).
    sub = 8 if x2.dtype == jnp.float32 else 16
    tm = min(512, _round_up(M, sub))
    if (pl.cdiv(M, tm) * (Np // tn)) < 2 and M > sub:
        tm = _round_up(pl.cdiv(M, 2), sub)
    Mp = _round_up(M, tm)

    xp = x2
    if Mp != M or Kp != k:
        xp = jnp.pad(x2, ((0, Mp - M), (0, Kp - k)))

    grid = (Mp // tm, Np // tn, Kp // tk)

    x_b = xp.dtype.itemsize
    w_b = weight_t.dtype.itemsize
    # Double-buffered x/w/out tiles + bias; generous but bounded budget.
    tile_bytes = 2 * (tm * tk * x_b + tk * tn * w_b + tm * tn * 4 + tn * 4)
    vmem_limit = int(min(64 << 20, max(tile_bytes + (8 << 20), 32 << 20)))

    bytes_accessed = (Kp * Np * w_b * (Mp // tm)        # weight re-streamed per M-block
                      + Mp * Kp * x_b * (Np // tn)      # x re-streamed per N-block
                      + Mp * Np * 4                      # output written once
                      + Np * 4 * (Mp // tm))             # bias

    kernel = functools.partial(_fc_kernel, apply_relu=relu)

    out = pl.pallas_call(
        kernel,
        out_shape=jax.ShapeDtypeStruct((Mp, Np), jnp.float32),
        grid_spec=pltpu.PrefetchScalarGridSpec(
            num_scalar_prefetch=0,
            grid=grid,
            in_specs=[
                pl.BlockSpec((tm, tk), lambda i, j, kk: (i, kk)),   # x (Mp, Kp)
                pl.BlockSpec((tk, tn), lambda i, j, kk: (kk, j)),   # weight^T (Kp, Np)
                pl.BlockSpec((1, tn), lambda i, j, kk: (0, j)),     # bias (1, Np)
            ],
            out_specs=pl.BlockSpec((tm, tn), lambda i, j, kk: (i, j)),
        ),
        compiler_params=pltpu.CompilerParams(
            dimension_semantics=("parallel", "parallel", "arbitrary"),
            vmem_limit_bytes=vmem_limit),
        cost_estimate=pl.CostEstimate(
            flops=2 * Mp * Np * Kp,
            transcendentals=0,
            bytes_accessed=bytes_accessed),
    )(xp, weight_t, bias2d)

    return out[:M, :n]


def fc_forward(x, params, *, relu=True):
    """y = relu(x @ W.T + b), matching torch.nn.Linear (+ optional ReLU)."""
    orig_shape = x.shape
    x2 = x.reshape(-1, orig_shape[-1])
    out = _fc_forward_impl(
        x2, params["weight_t"], params["bias2d"],
        relu=relu, n=params["n"], k=params["k"],
        tn=params["tn"], tk=params["tk"])
    return out.reshape(orig_shape[:-1] + (params["n"],))


if __name__ == "__main__":
    batch, in_features, out_features = 8, 32, 64

    key = jax.random.PRNGKey(0)
    kx, kw, kb = jax.random.split(key, 3)
    x = jax.random.normal(kx, (batch, in_features), dtype=jnp.float32)
    # Deterministic init mimicking nn.Linear's uniform(-1/sqrt(in), 1/sqrt(in)).
    bound = 1.0 / (in_features ** 0.5)
    weight = jax.random.uniform(kw, (out_features, in_features),
                                minval=-bound, maxval=bound, dtype=jnp.float32)
    bias = jax.random.uniform(kb, (out_features,),
                              minval=-bound, maxval=bound, dtype=jnp.float32)

    # One-time parameter prep (pad + transpose), f32 path.
    params = init_fc_params(weight, bias)

    out = fc_forward(x, params, relu=True)
    jax.block_until_ready(out)
    ref = jnp.maximum(x @ weight.T + bias, 0.0)
    assert out.shape == (batch, out_features)
    assert jnp.allclose(out, ref, atol=1e-5, rtol=1e-5)

    # relu=False path (FC(..., relu=False)).
    out_nr = fc_forward(x, params, relu=False)
    jax.block_until_ready(out_nr)
    assert jnp.allclose(out_nr, x @ weight.T + bias, atol=1e-5, rtol=1e-5)

    # Leading batch dims are flattened like nn.Linear.
    x3 = jax.random.normal(kx, (2, 4, in_features), dtype=jnp.float32)
    out3 = fc_forward(x3, params, relu=True)
    jax.block_until_ready(out3)
    ref3 = jnp.maximum(jnp.einsum("bsk,nk->bsn", x3, weight) + bias, 0.0)
    assert out3.shape == (2, 4, out_features)
    assert jnp.allclose(out3, ref3, atol=1e-5, rtol=1e-5)

    # Optional bf16 weight stream (halved HBM traffic), f32 accumulation.
    params_bf16 = init_fc_params(weight, bias, param_dtype=jnp.bfloat16)
    out_bf16 = fc_forward(x, params_bf16, relu=True)
    jax.block_until_ready(out_bf16)
    assert jnp.allclose(out_bf16, ref, atol=1e-1, rtol=5e-2)

    print("KERNEL_OK")
</pallas_src>

<mosaic_0001>
module attributes {stable_mosaic.version = 11 : i64} {
  func.func @_fc_kernel(%arg0: i32, %arg1: i32, %arg2: i32, %arg3: memref<8x128xf32, #tpu.memory_space<vmem>>, %arg4: memref<128x128xf32, #tpu.memory_space<vmem>>, %arg5: memref<1x128xf32, #tpu.memory_space<vmem>>, %arg6: memref<8x128xf32, #tpu.memory_space<vmem>>) attributes {dimension_semantics = [#tpu.dimension_semantics<parallel>, #tpu.dimension_semantics<parallel>, #tpu.dimension_semantics<arbitrary>], iteration_bounds = array<i64: 1, 1, 1>, scalar_prefetch = 0 : i64, scratch_operands = 0 : i64, tpu.core_type = #tpu.core_type<tc>, window_params = [{transform_indices = @transform_0, window_bounds = array<i64: 8, 128>}, {transform_indices = @transform_1, window_bounds = array<i64: 128, 128>}, {transform_indices = @transform_2, window_bounds = array<i64: 1, 128>}, {transform_indices = @transform_3, window_bounds = array<i64: 8, 128>}]} {
    %c0_i32 = arith.constant 0 : i32
    %0 = arith.cmpi eq, %arg2, %c0_i32 : i32
    %1 = arith.extui %0 : i1 to i32
    %c0_i32_0 = arith.constant 0 : i32
    %2 = arith.cmpi ne, %1, %c0_i32_0 : i32
    scf.if %2 {
      %cst_10 = arith.constant 0.000000e+00 : f32
      %12 = vector.broadcast %cst_10 : f32 to vector<8x128xf32>
      %c0_11 = arith.constant 0 : index
      %c0_12 = arith.constant 0 : index
      %13 = vector.load %arg6[%c0_11, %c0_12] : memref<8x128xf32, #tpu.memory_space<vmem>>, vector<8x128xf32>
      tpu.vector_store %arg6[%c0_11, %c0_12], %12 {strides = array<i32>} : memref<8x128xf32, #tpu.memory_space<vmem>>, vector<8x128xf32>,
    } else {
    }
    %c0 = arith.constant 0 : index
    %c0_1 = arith.constant 0 : index
    %3 = vector.load %arg3[%c0, %c0_1] : memref<8x128xf32, #tpu.memory_space<vmem>>, vector<8x128xf32>
    %c0_2 = arith.constant 0 : index
    %c0_3 = arith.constant 0 : index
    %4 = vector.load %arg6[%c0_2, %c0_3] : memref<8x128xf32, #tpu.memory_space<vmem>>, vector<8x128xf32>
    %c0_4 = arith.constant 0 : index
    %c0_5 = arith.constant 0 : index
    %5 = vector.load %arg4[%c0_4, %c0_5] : memref<128x128xf32, #tpu.memory_space<vmem>>, vector<128x128xf32>
    %cst = arith.constant dense<0.000000e+00> : vector<8x128xf32>
    %6 = tpu.matmul %3, %5, %cst {dimension_numbers = #tpu.dot_dimension_numbers<[1], [0], [0], [1], [0, 0, 1, 1], [], []>} : vector<8x128xf32>, vector<128x128xf32>, vector<8x128xf32> -> vector<8x128xf32>
    %7 = arith.addf %4, %6 : vector<8x128xf32>
    %c0_6 = arith.constant 0 : index
    %c0_7 = arith.constant 0 : index
    %8 = vector.load %arg6[%c0_6, %c0_7] : memref<8x128xf32, #tpu.memory_space<vmem>>, vector<8x128xf32>
    tpu.vector_store %arg6[%c0_6, %c0_7], %7 {strides = array<i32>} : memref<8x128xf32, #tpu.memory_space<vmem>>, vector<8x128xf32>,
    %c0_i32_8 = arith.constant 0 : i32
    %9 = arith.cmpi eq, %arg2, %c0_i32_8 : i32
    %10 = arith.extui %9 : i1 to i32
    %c0_i32_9 = arith.constant 0 : i32
    %11 = arith.cmpi ne, %10, %c0_i32_9 : i32
    scf.if %11 {
      %c0_10 = arith.constant 0 : index
      %c0_11 = arith.constant 0 : index
      %12 = vector.load %arg6[%c0_10, %c0_11] : memref<8x128xf32, #tpu.memory_space<vmem>>, vector<8x128xf32>
      %c0_12 = arith.constant 0 : index
      %c0_13 = arith.constant 0 : index
      %13 = vector.load %arg5[%c0_12, %c0_13] : memref<1x128xf32, #tpu.memory_space<vmem>>, vector<1x128xf32>
      %14 = vector.broadcast %13 : vector<1x128xf32> to vector<8x128xf32>
      %15 = arith.addf %12, %14 : vector<8x128xf32>
      %cst_14 = arith.constant 0.000000e+00 : f32
      %16 = vector.broadcast %cst_14 : f32 to vector<8x128xf32>
      %17 = arith.maximumf %15, %16 : vector<8x128xf32>
      %c0_15 = arith.constant 0 : index
      %c0_16 = arith.constant 0 : index
      %18 = vector.load %arg6[%c0_15, %c0_16] : memref<8x128xf32, #tpu.memory_space<vmem>>, vector<8x128xf32>
      tpu.vector_store %arg6[%c0_15, %c0_16], %17 {strides = array<i32>} : memref<8x128xf32, #tpu.memory_space<vmem>>, vector<8x128xf32>,
    } else {
    }
    return
  }
  func.func @transform_0(%arg0: i32, %arg1: i32, %arg2: i32) -> (i32, i32) {
    %c0_i32 = arith.constant 0 : i32
    return %arg0, %arg2 : i32, i32
  }
  func.func @transform_1(%arg0: i32, %arg1: i32, %arg2: i32) -> (i32, i32) {
    %c0_i32 = arith.constant 0 : i32
    return %arg2, %arg1 : i32, i32
  }
  func.func @transform_2(%arg0: i32, %arg1: i32, %arg2: i32) -> (i32, i32) {
    %c0_i32 = arith.constant 0 : i32
    %c0_i32_0 = arith.constant 0 : i32
    return %c0_i32, %arg1 : i32, i32
  }
  func.func @transform_3(%arg0: i32, %arg1: i32, %arg2: i32) -> (i32, i32) {
    %c0_i32 = arith.constant 0 : i32
    return %arg0, %arg1 : i32, i32
  }
}

</mosaic_0001>

<bundles_post_ra>
// kernel: _fc_forward_impl.1
= control target key start
LH: loop header
LB: loop body
LE: loop exit
PB: predicated region body
PF: predicated region fallthrough
CT: control target
= control target key end

     0   :  { %8 = vsyncpa [#allocation3], 0  ;;  %s342_s0 = inlined_call_operand.vmem [shape: f32[8,128], index: 0, kind: input, shape index: {}]   ;;  %s343_s1 = inlined_call_operand.hbm [shape: f32[128,128], index: 1, kind: input, shape index: {}]   ;;  %s344_s2 = inlined_call_operand.vmem [shape: f32[1,128], index: 2, kind: input, shape index: {}]   ;;  %s345_s3 = inlined_call_operand.hbm [shape: f32[8,128], index: 3, kind: output, shape index: {}]  }
   0x1   :  { %9 = vsyncpa [#allocation4], 0  ;;  %s285_s12 = smov [#allocation2]   ;;  %s237_s16 = scalar_lea.hbm %s343_s1, 2048 }
   0x2   :  { %s17_s13 = sshll.u32 %s285_s12, 4  ;;  %p238_p0 = scmp.ne.s32.totalorder %s343_s1, %s237_s16  ;;  %s18_s13 = int_to_ptr.vmem [resolvable:$true] %s17_s13 }
   0x3   :  { %p241_p1 = scmp.lt.u32.totalorder %s237_s16, %s343_s1 }
   0x5   :  { %p243_p2 = pnand %p241_p1, %p238_p0 }
   0x7   :  { %246 = shalt.err (!%p243_p2)
}
   0x8   :  { %s247_s21 = scalar_lea.vmem %s18_s13, 2048  ;;  %p252_p4 = scmp.lt.s32.totalorder %s18_s13, %s18_s13 }
   0x9   :  { %p248_p3 = scmp.ne.s32.totalorder %s18_s13, %s247_s21  ;;  %p253_p5 = scmp.lt.s32.totalorder %s247_s21, %s247_s21 }
   0xb   :  { %p254_p6 = por %p253_p5, %p252_p4 }
   0xd   :  { %p255_p7 = pnand %p254_p6, %p248_p3 }
   0xf   :  { %258 = shalt.err (!%p255_p7)
}
  0x10   :  { %s286_s22 = smov 128   ;;  %s287_s23 = smov 8  }
  0x11   :  { %23 = dma.hbm_to_vmem [thread:$0]  %s343_s1, 2048, %s18_s13, [#allocation3], %s286_s22, %s286_s22, %s287_s23  }
  0x12   :  { %281 = dma.done.wait [#allocation3], 2048  }
  0x13   :  { %282 = vsyncadd [#allocation3], 4294965248  ;;  %v288_v0 = vmov 0.0|0.0   ;;  %vm289_vm0 = vmmov 0   ;;  %v290_v1 = vmov 0.0   ;;  %v36_v2 = vld [vmem:[#allocation2] sm:$0xff] }
  0x14   :  { %206 = vmatprep.subr.bf16.mxu0 %v288_v0  ;;  %203 = vmatprep.mubr.msk.f32.mxu0 %vm289_vm0, %v290_v1  ;;  %v37_v3 = vld [vmem:[#allocation2 + $0x8] sm:$0xff]  ;;  %v38_v4 = vld [vmem:[#allocation2 + $0x10] sm:$0xff]  ;;  %v39_v6 = vld [vmem:[#allocation2 + $0x18] sm:$0xff]  ;;  %s291_s29 = smov [#allocation5]  }
  0x15   :  { %v207_v5 = vpack.c.bf16 %v37_v3, %v36_v2  ;;  %v210_v7 = vpack.c.bf16 %v39_v6, %v38_v4  ;;  %v40_v8 = vld [vmem:[#allocation2 + $0x20] sm:$0xff]  ;;  %v41_v9 = vld [vmem:[#allocation2 + $0x28] sm:$0xff]  ;;  %v42_v11 = vld [vmem:[#allocation2 + $0x30] sm:$0xff]  ;;  %s144_s30 = sshll.u32 %s291_s29, 4  ;;  %s145_s30 = int_to_ptr.vmem [resolvable:$true] %s144_s30 }
  0x16   :  { %v213_v10 = vpack.c.bf16 %v41_v9, %v40_v8  ;;  %v43_v12 = vld [vmem:[#allocation2 + $0x38] sm:$0xff]  ;;  %v44_v14 = vld [vmem:[#allocation2 + $0x40] sm:$0xff]  ;;  %v45_v15 = vld [vmem:[#allocation2 + $0x48] sm:$0xff]  ;;  %s259_s4 = scalar_lea.vmem %s145_s30, 128  ;;  %p264_p9 = scmp.lt.s32.totalorder %s145_s30, %s145_s30 }
  0x17   :  { %208 = vmatpush3.bf16.msra.mxu0 %v207_v5  ;;  %v216_v13 = vpack.c.bf16 %v43_v12, %v42_v11  ;;  %v219_v16 = vpack.c.bf16 %v45_v15, %v44_v14  ;;  %v46_v17 = vld [vmem:[#allocation2 + $0x50] sm:$0xff]  ;;  %v47_v18 = vld [vmem:[#allocation2 + $0x58] sm:$0xff]  ;;  %v48_v20 = vld [vmem:[#allocation2 + $0x60] sm:$0xff]  ;;  %p260_p8 = scmp.ne.s32.totalorder %s145_s30, %s259_s4  ;;  %p265_p10 = scmp.lt.s32.totalorder %s259_s4, %s259_s4 }
  0x18   :  { %209 = vmatprep.subr.bf16.mxu0 %v288_v0  ;;  %v222_v19 = vpack.c.bf16 %v47_v18, %v46_v17  ;;  %v49_v21 = vld [vmem:[#allocation2 + $0x68] sm:$0xff]  ;;  %v50_v23 = vld [vmem:[#allocation2 + $0x70] sm:$0xff]  ;;  %v51_v24 = vld [vmem:[#allocation2 + $0x78] sm:$0xff] }
  0x19   :  { %v225_v22 = vpack.c.bf16 %v49_v21, %v48_v20  ;;  %v228_v25 = vpack.c.bf16 %v51_v24, %v50_v23  ;;  %v34_v26 = vld [vmem:[%s342_s0] sm:$0xff]  ;;  %p266_p11 = por %p265_p10, %p264_p9 }
  0x1a   :  { %v153_v28 = vld [vmem:[%s344_s2] ss:$0 sm:$0xff] }
  0x1b   :  { %211 = vmatpush3.bf16.msra.mxu0 %v210_v7  ;;  %p267_p12 = pnand %p266_p11, %p260_p8 }
  0x1c   :  { %212 = vmatprep.subr.bf16.mxu0 %v288_v0 }
  0x1f   :  { %214 = vmatpush3.bf16.msra.mxu0 %v213_v10 }
  0x20   :  { %215 = vmatprep.subr.bf16.mxu0 %v288_v0 }
  0x23   :  { %217 = vmatpush3.bf16.msra.mxu0 %v216_v13 }
  0x24   :  { %218 = vmatprep.subr.bf16.mxu0 %v288_v0 }
  0x27   :  { %220 = vmatpush3.bf16.msra.mxu0 %v219_v16 }
  0x28   :  { %221 = vmatprep.subr.bf16.mxu0 %v288_v0 }
  0x2b   :  { %223 = vmatpush3.bf16.msra.mxu0 %v222_v19 }
  0x2c   :  { %224 = vmatprep.subr.bf16.mxu0 %v288_v0 }
  0x2f   :  { %226 = vmatpush3.bf16.msra.mxu0 %v225_v22 }
  0x30   :  { %227 = vmatprep.subr.bf16.mxu0 %v288_v0 }
  0x33   :  { %229 = vmatpush3.bf16.msra.mxu0 %v228_v25 }
  0x36   :  { %204 = vmatmul.mubr.f32.vlgmr.msra.gmra.mrb[0].mxu0 %v34_v26 }
 0x109   :  { %v118_v27 = vpop.f32.mrb[0].mxu0 }
 0x10a   :  { %v205_v29 = vpop.f32.mrb[1].mxu0  ;;  %v135_v30 = vadd.f32 %v153_v28, %v118_v27 }
 0x10c   :  { %v136_v31 = vmax.f32 %v135_v30, 0.0 }
 0x10e   :  { %137 = vst [vmem:[#allocation5] sm:$0xff] %v136_v31 }
 0x10f   :  { %270 = shalt.err (!%p267_p12)
}
 0x110   :  { %s271_s6 = scalar_lea.hbm %s345_s3, 128 }
 0x111   :  { %p272_p13 = scmp.ne.s32.totalorder %s345_s3, %s271_s6  ;;  %p275_p0 = scmp.lt.u32.totalorder %s271_s6, %s345_s3 }
 0x113   :  { %p277_p1 = pnand %p275_p0, %p272_p13 }
 0x115   :  { %280 = shalt.err (!%p277_p1)
}
 0x116   :  { %147 = dma.vmem_to_hbm [thread:$0]  %s145_s30, 128, %s345_s3, [#allocation4]  }
 0x117   :  { %283 = dma.done.wait [#allocation4], 128  }
 0x118   :  { %284 = vsyncadd [#allocation4], 4294967168 }
 0x119   :  { %151 = vsyncpa [#allocation3], 1 }
 0x11a   :  { %152 = vsyncpa [#allocation4], 1 }

</bundles_post_ra>
